<compile_context>
chip_gen: v7x
topology: tpu7x:2x2x1
jax: 0.10.0
libtpu: 0.0.40
codegen_flags: <defaults>
</compile_context>

<pallas_src>
import functools

import jax
import jax.numpy as jnp
from jax import lax
from jax.experimental import pallas as pl
from jax.experimental.pallas import tpu as pltpu

LANE = 128
SUBLANE = 8


def _sie_kernel(yt_ref, yp_ref, sum_d_ref, sum_dd_ref, *,
                n_rows, tile_rows, tiles_per_split, mask_from, total_slots):
    s = pl.program_id(0)   # split (parallel across TensorCores where available)
    k = pl.program_id(1)   # reduction step within the split

    @pl.when(k == 0)
    def _():
        sum_d_ref[...] = jnp.zeros_like(sum_d_ref)
        sum_dd_ref[...] = jnp.zeros_like(sum_dd_ref)

    # Upcast in-kernel (VPU); the DMA carried the native dtype.
    yp = yp_ref[...].astype(jnp.float32)
    yt = yt_ref[...].astype(jnp.float32)
    d = jnp.log(jnp.maximum(yp, 1e-4)) - jnp.log(jnp.maximum(yt, 1e-4))

    def accumulate(dm):
        # (t, 128) -> (t//8, 8, 128); sum over the leading axis is pure vreg adds
        # into a single-vreg accumulator. Cross-lane reduce happens in the wrapper.
        d3 = dm.reshape(tile_rows // SUBLANE, SUBLANE, LANE)
        sum_d_ref[...] += jnp.sum(d3, axis=0)
        sum_dd_ref[...] += jnp.sum(d3 * d3, axis=0)

    if mask_from >= total_slots:
        # Every tile in every split is full: no masking anywhere.
        accumulate(d)
    else:
        g = s * tiles_per_split + k   # intended global tile index

        @pl.when(g < mask_from)
        def _():
            accumulate(d)

        @pl.when(g >= mask_from)
        def _():
            # Boundary / overhang tiles: zero rows beyond the real array
            # (boundary blocks contain garbage; overhang slots re-read a clamped
            # block whose intended global rows are all >= n_rows).
            row_ids = (lax.broadcasted_iota(jnp.int32, (tile_rows, LANE), 0)
                       + g * tile_rows)
            accumulate(jnp.where(row_ids < n_rows, d, 0.0))


def scale_invariant_error(y_true, y_pred, lamada=0.5, tile_rows=4096,
                          num_splits=2):
    """Pallas implementation of ScaleInvariantError.forward (scalar f32)."""
    assert y_true.shape == y_pred.shape
    n_elems = int(y_true.size)
    assert n_elems > 0, "ScaleInvariantError on an empty tensor"

    yt = jnp.ravel(y_true)
    yp = jnp.ravel(y_pred)

    n_rows = n_elems // LANE
    n_aligned = n_rows * LANE

    sum_d = jnp.float32(0.0)
    sum_dd = jnp.float32(0.0)

    if n_rows > 0:
        if n_aligned == n_elems:
            yt_mat = yt.reshape(n_rows, LANE)
            yp_mat = yp.reshape(n_rows, LANE)
        else:
            # Aligned prefix only; the <=127-element tail is folded in below.
            yt_mat = yt[:n_aligned].reshape(n_rows, LANE)
            yp_mat = yp[:n_aligned].reshape(n_rows, LANE)

        itemsize = jnp.dtype(y_true.dtype).itemsize
        # Packing-aware row alignment: 8 (f32), 16 (bf16), 32 (int8/fp8).
        row_align = SUBLANE * max(1, 4 // itemsize)
        n_rows_padded = -(-n_rows // row_align) * row_align
        t = max(row_align, (int(tile_rows) // row_align) * row_align)
        t = min(t, n_rows_padded)

        num_tiles = -(-n_rows // t)
        splits = max(1, min(int(num_splits), num_tiles))
        tiles_per_split = -(-num_tiles // splits)
        total_slots = splits * tiles_per_split
        # First global tile index whose rows need masking.
        mask_from = num_tiles - 1 if (n_rows % t != 0) else num_tiles

        if total_slots > num_tiles:
            def in_map(s, k):
                # Overhang slots re-read the last real block (masked in-kernel).
                return (jnp.minimum(s * tiles_per_split + k, num_tiles - 1), 0)
        else:
            def in_map(s, k):
                return (s * tiles_per_split + k, 0)

        kernel = functools.partial(
            _sie_kernel, n_rows=n_rows, tile_rows=t,
            tiles_per_split=tiles_per_split, mask_from=mask_from,
            total_slots=total_slots)

        cost = pl.CostEstimate(
            flops=6 * n_aligned,
            transcendentals=2 * n_aligned,
            bytes_accessed=2 * n_aligned * itemsize
                           + 2 * splits * SUBLANE * LANE * 4)

        out_struct = jax.ShapeDtypeStruct((splits * SUBLANE, LANE), jnp.float32)
        part_d, part_dd = pl.pallas_call(
            kernel,
            out_shape=(out_struct, out_struct),
            grid_spec=pltpu.PrefetchScalarGridSpec(
                num_scalar_prefetch=0,
                grid=(splits, tiles_per_split),
                in_specs=[
                    pl.BlockSpec((t, LANE), in_map),
                    pl.BlockSpec((t, LANE), in_map),
                ],
                out_specs=[
                    pl.BlockSpec((SUBLANE, LANE), lambda s, k: (s, 0)),
                    pl.BlockSpec((SUBLANE, LANE), lambda s, k: (s, 0)),
                ],
            ),
            compiler_params=pltpu.CompilerParams(
                dimension_semantics=("parallel", "arbitrary")),
            cost_estimate=cost,
        )(yt_mat, yp_mat)

        sum_d = jnp.sum(part_d)
        sum_dd = jnp.sum(part_dd)

    if n_aligned < n_elems:
        # <=127-element ragged tail: plain jnp, no padded copy of the inputs.
        dt = (jnp.log(jnp.maximum(yp[n_aligned:].astype(jnp.float32), 1e-4))
              - jnp.log(jnp.maximum(yt[n_aligned:].astype(jnp.float32), 1e-4)))
        sum_d = sum_d + jnp.sum(dt)
        sum_dd = sum_dd + jnp.sum(dt * dt)

    n = jnp.float32(n_elems)
    mean_d = sum_d / n
    return sum_dd / n - jnp.float32(lamada) * mean_d * mean_d


def _reference(y_true, y_pred, lamada=0.5):
    d = (jnp.log(jnp.maximum(y_pred.astype(jnp.float32), 1e-4))
         - jnp.log(jnp.maximum(y_true.astype(jnp.float32), 1e-4)))
    return jnp.mean(d * d) - lamada * jnp.mean(d) * jnp.mean(d)


if __name__ == "__main__":
    key = jax.random.PRNGKey(0)
    k1, k2, k3, k4 = jax.random.split(key, 4)

    # Small NCHW depth-map-like inputs (positive-ish; the clamp handles the rest).
    y_true = jax.random.uniform(k1, (2, 4, 16, 16), jnp.float32, 0.0, 10.0)
    y_pred = jax.random.uniform(k2, (2, 4, 16, 16), jnp.float32, 0.0, 10.0)
    ref = _reference(y_true, y_pred, 0.5)

    # 1) Default config (single tile, single split).
    loss = jax.block_until_ready(scale_invariant_error(y_true, y_pred, 0.5))
    assert jnp.allclose(loss, ref, rtol=1e-5, atol=1e-6), (loss, ref)

    # 2) Multi-tile + 2-way split accumulation path.
    loss2 = jax.block_until_ready(
        scale_invariant_error(y_true, y_pred, 0.5, tile_rows=8))
    assert jnp.allclose(loss2, ref, rtol=1e-5, atol=1e-6), (loss2, ref)

    # 3) Non-128-aligned element count: ragged tail folded in the wrapper,
    #    boundary rows masked in-kernel.
    yt_odd = jax.random.uniform(k3, (3, 5, 7, 11), jnp.float32, 0.0, 10.0)
    yp_odd = jax.random.uniform(k4, (3, 5, 7, 11), jnp.float32, 0.0, 10.0)
    ref_odd = _reference(yt_odd, yp_odd, 0.5)
    loss3 = jax.block_until_ready(scale_invariant_error(yt_odd, yp_odd, 0.5))
    assert jnp.allclose(loss3, ref_odd, rtol=1e-5, atol=1e-6), (loss3, ref_odd)
    loss4 = jax.block_until_ready(
        scale_invariant_error(yt_odd, yp_odd, 0.5, tile_rows=8))
    assert jnp.allclose(loss4, ref_odd, rtol=1e-5, atol=1e-6), (loss4, ref_odd)

    # 4) bf16 inputs: packing-aware tile rounding + native-dtype DMA.
    yt_bf = y_true.astype(jnp.bfloat16)
    yp_bf = y_pred.astype(jnp.bfloat16)
    ref_bf = _reference(yt_bf, yp_bf, 0.5)
    loss5 = jax.block_until_ready(scale_invariant_error(yt_bf, yp_bf, 0.5))
    assert jnp.allclose(loss5, ref_bf, rtol=1e-4, atol=1e-5), (loss5, ref_bf)

    print("KERNEL_OK")
</pallas_src>

<mosaic_0001>
module attributes {stable_mosaic.version = 11 : i64} {
  func.func @_sie_kernel(%arg0: i32, %arg1: i32, %arg2: memref<16x128xf32, #tpu.memory_space<vmem>>, %arg3: memref<16x128xf32, #tpu.memory_space<vmem>>, %arg4: memref<8x128xf32, #tpu.memory_space<vmem>>, %arg5: memref<8x128xf32, #tpu.memory_space<vmem>>) attributes {dimension_semantics = [#tpu.dimension_semantics<parallel>, #tpu.dimension_semantics<arbitrary>], iteration_bounds = array<i64: 1, 1>, scalar_prefetch = 0 : i64, scratch_operands = 0 : i64, tpu.core_type = #tpu.core_type<tc>, window_params = [{transform_indices = @transform_0, window_bounds = array<i64: 16, 128>}, {transform_indices = @transform_1, window_bounds = array<i64: 16, 128>}, {transform_indices = @transform_2, window_bounds = array<i64: 8, 128>}, {transform_indices = @transform_3, window_bounds = array<i64: 8, 128>}]} {
    %c0_i32 = arith.constant 0 : i32
    %0 = arith.cmpi eq, %arg1, %c0_i32 : i32
    %1 = arith.extui %0 : i1 to i32
    %c0_i32_0 = arith.constant 0 : i32
    %2 = arith.cmpi ne, %1, %c0_i32_0 : i32
    scf.if %2 {
      %cst_15 = arith.constant 0.000000e+00 : f32
      %22 = vector.broadcast %cst_15 : f32 to vector<8x128xf32>
      %c0_16 = arith.constant 0 : index
      %c0_17 = arith.constant 0 : index
      %23 = vector.load %arg4[%c0_16, %c0_17] : memref<8x128xf32, #tpu.memory_space<vmem>>, vector<8x128xf32>
      tpu.vector_store %arg4[%c0_16, %c0_17], %22 {strides = array<i32>} : memref<8x128xf32, #tpu.memory_space<vmem>>, vector<8x128xf32>,
      %cst_18 = arith.constant 0.000000e+00 : f32
      %24 = vector.broadcast %cst_18 : f32 to vector<8x128xf32>
      %c0_19 = arith.constant 0 : index
      %c0_20 = arith.constant 0 : index
      %25 = vector.load %arg5[%c0_19, %c0_20] : memref<8x128xf32, #tpu.memory_space<vmem>>, vector<8x128xf32>
      tpu.vector_store %arg5[%c0_19, %c0_20], %24 {strides = array<i32>} : memref<8x128xf32, #tpu.memory_space<vmem>>, vector<8x128xf32>,
    } else {
    }
    %c0 = arith.constant 0 : index
    %c0_1 = arith.constant 0 : index
    %3 = vector.load %arg3[%c0, %c0_1] : memref<16x128xf32, #tpu.memory_space<vmem>>, vector<16x128xf32>
    %c0_2 = arith.constant 0 : index
    %c0_3 = arith.constant 0 : index
    %4 = vector.load %arg2[%c0_2, %c0_3] : memref<16x128xf32, #tpu.memory_space<vmem>>, vector<16x128xf32>
    %cst = arith.constant 9.99999974E-5 : f32
    %5 = vector.broadcast %cst : f32 to vector<16x128xf32>
    %6 = arith.maximumf %3, %5 : vector<16x128xf32>
    %7 = math.log %6 : vector<16x128xf32>
    %cst_4 = arith.constant 9.99999974E-5 : f32
    %8 = vector.broadcast %cst_4 : f32 to vector<16x128xf32>
    %9 = arith.maximumf %4, %8 : vector<16x128xf32>
    %10 = math.log %9 : vector<16x128xf32>
    %11 = arith.subf %7, %10 : vector<16x128xf32>
    %12 = vector.shape_cast %11 : vector<16x128xf32> to vector<2x8x128xf32>
    %c0_5 = arith.constant 0 : index
    %c0_6 = arith.constant 0 : index
    %13 = vector.load %arg4[%c0_5, %c0_6] : memref<8x128xf32, #tpu.memory_space<vmem>>, vector<8x128xf32>
    %cst_7 = arith.constant dense<0.000000e+00> : vector<8x128xf32>
    %14 = vector.multi_reduction <add>, %12, %cst_7 [0] : vector<2x8x128xf32> to vector<8x128xf32>
    %15 = arith.addf %13, %14 : vector<8x128xf32>
    %c0_8 = arith.constant 0 : index
    %c0_9 = arith.constant 0 : index
    %16 = vector.load %arg4[%c0_8, %c0_9] : memref<8x128xf32, #tpu.memory_space<vmem>>, vector<8x128xf32>
    tpu.vector_store %arg4[%c0_8, %c0_9], %15 {strides = array<i32>} : memref<8x128xf32, #tpu.memory_space<vmem>>, vector<8x128xf32>,
    %c0_10 = arith.constant 0 : index
    %c0_11 = arith.constant 0 : index
    %17 = vector.load %arg5[%c0_10, %c0_11] : memref<8x128xf32, #tpu.memory_space<vmem>>, vector<8x128xf32>
    %18 = arith.mulf %12, %12 : vector<2x8x128xf32>
    %cst_12 = arith.constant dense<0.000000e+00> : vector<8x128xf32>
    %19 = vector.multi_reduction <add>, %18, %cst_12 [0] : vector<2x8x128xf32> to vector<8x128xf32>
    %20 = arith.addf %17, %19 : vector<8x128xf32>
    %c0_13 = arith.constant 0 : index
    %c0_14 = arith.constant 0 : index
    %21 = vector.load %arg5[%c0_13, %c0_14] : memref<8x128xf32, #tpu.memory_space<vmem>>, vector<8x128xf32>
    tpu.vector_store %arg5[%c0_13, %c0_14], %20 {strides = array<i32>} : memref<8x128xf32, #tpu.memory_space<vmem>>, vector<8x128xf32>,
    return
  }
  func.func @transform_0(%arg0: i32, %arg1: i32) -> (i32, i32) {
    %c1_i32 = arith.constant 1 : i32
    %0 = arith.muli %arg0, %c1_i32 : i32
    %1 = arith.addi %0, %arg1 : i32
    %c0_i32 = arith.constant 0 : i32
    %c0_i32_0 = arith.constant 0 : i32
    return %1, %c0_i32 : i32, i32
  }
  func.func @transform_1(%arg0: i32, %arg1: i32) -> (i32, i32) {
    %c1_i32 = arith.constant 1 : i32
    %0 = arith.muli %arg0, %c1_i32 : i32
    %1 = arith.addi %0, %arg1 : i32
    %c0_i32 = arith.constant 0 : i32
    %c0_i32_0 = arith.constant 0 : i32
    return %1, %c0_i32 : i32, i32
  }
  func.func @transform_2(%arg0: i32, %arg1: i32) -> (i32, i32) {
    %c0_i32 = arith.constant 0 : i32
    %c0_i32_0 = arith.constant 0 : i32
    return %arg0, %c0_i32 : i32, i32
  }
  func.func @transform_3(%arg0: i32, %arg1: i32) -> (i32, i32) {
    %c0_i32 = arith.constant 0 : i32
    %c0_i32_0 = arith.constant 0 : i32
    return %arg0, %c0_i32 : i32, i32
  }
}

</mosaic_0001>

<bundles_post_ra>
// kernel: tpu_custom_call.1
= control target key start
LH: loop header
LB: loop body
LE: loop exit
PB: predicated region body
PF: predicated region fallthrough
CT: control target
= control target key end

     0   :  { %9 = vsyncpa [#allocation3], 0  ;;  %s304_s0 = inlined_call_operand.hbm [shape: f32[16,128], index: 0, kind: input, shape index: {}]   ;;  %s305_s1 = inlined_call_operand.hbm [shape: f32[16,128], index: 1, kind: input, shape index: {}]   ;;  %s306_s2 = inlined_call_operand.hbm [shape: f32[8,128], index: 2, kind: output, shape index: {0}]   ;;  %s307_s3 = inlined_call_operand.hbm [shape: f32[8,128], index: 3, kind: output, shape index: {1}]  }
   0x1   :  { %10 = vsyncpa [#allocation6], 0 }
   0x2   :  { %11 = vsyncpa [#allocation4], 0 }
   0x3   :  { %12 = vsyncpa [#allocation9], 0  ;;  %s230_s12 = smov [#allocation2]   ;;  %s134_s16 = scalar_lea.hbm %s304_s0, 256 }
   0x4   :  { %s22_s13 = sshll.u32 %s230_s12, 4  ;;  %p135_p0 = scmp.ne.s32.totalorder %s304_s0, %s134_s16  ;;  %s23_s13 = int_to_ptr.vmem [resolvable:$true] %s22_s13 }
   0x5   :  { %p138_p1 = scmp.lt.u32.totalorder %s134_s16, %s304_s0 }
   0x7   :  { %p140_p2 = pnand %p138_p1, %p135_p0 }
   0x9   :  { %143 = shalt.err (!%p140_p2)
}
   0xa   :  { %s144_s21 = scalar_lea.vmem %s23_s13, 256  ;;  %p149_p4 = scmp.lt.s32.totalorder %s23_s13, %s23_s13 }
   0xb   :  { %p145_p3 = scmp.ne.s32.totalorder %s23_s13, %s144_s21  ;;  %p150_p5 = scmp.lt.s32.totalorder %s144_s21, %s144_s21 }
   0xd   :  { %p151_p6 = por %p150_p5, %p149_p4 }
   0xf   :  { %p152_p7 = pnand %p151_p6, %p145_p3 }
  0x11   :  { %155 = shalt.err (!%p152_p7)
}
  0x12   :  { %s231_s22 = smov 128   ;;  %s232_s23 = smov 8  }
  0x13   :  { %28 = dma.hbm_to_vmem [thread:$0]  %s304_s0, 256, %s23_s13, [#allocation3], %s231_s22, %s231_s22, %s232_s23  }
  0x14   :  { %s233_s26 = smov [#allocation5]   ;;  %s156_s30 = scalar_lea.hbm %s305_s1, 256 }
  0x15   :  { %s38_s27 = sshll.u32 %s233_s26, 4  ;;  %p157_p8 = scmp.ne.s32.totalorder %s305_s1, %s156_s30  ;;  %s39_s27 = int_to_ptr.vmem [resolvable:$true] %s38_s27 }
  0x16   :  { %p160_p9 = scmp.lt.u32.totalorder %s156_s30, %s305_s1 }
  0x18   :  { %p162_p10 = pnand %p160_p9, %p157_p8 }
  0x1a   :  { %165 = shalt.err (!%p162_p10)
}
  0x1b   :  { %s166_s8 = scalar_lea.vmem %s39_s27, 256  ;;  %p171_p12 = scmp.lt.s32.totalorder %s39_s27, %s39_s27 }
  0x1c   :  { %p167_p11 = scmp.ne.s32.totalorder %s39_s27, %s166_s8  ;;  %p172_p13 = scmp.lt.s32.totalorder %s166_s8, %s166_s8 }
  0x1e   :  { %p173_p0 = por %p172_p13, %p171_p12 }
  0x20   :  { %p174_p1 = pnand %p173_p0, %p167_p11 }
  0x22   :  { %177 = shalt.err (!%p174_p1)
}
  0x23   :  { %44 = dma.hbm_to_vmem [thread:$0]  %s305_s1, 256, %s39_s27, [#allocation6], %s231_s22, %s231_s22, %s232_s23  }
  0x24   :  { %222 = dma.done.wait [#allocation3], 256  }
  0x25   :  { %223 = vsyncadd [#allocation3], 4294967040 }
  0x26   :  { %224 = dma.done.wait [#allocation6], 256  }
  0x27   :  { %225 = vsyncadd [#allocation6], 4294967040  ;;  %v61_v0 = vld [vmem:[#allocation5] sm:$0xff]  ;;  %v62_v1 = vld [vmem:[#allocation5 + $0x8] sm:$0xff]  ;;  %s234_s1 = smov [#allocation7]   ;;  %s235_s11 = smov [#allocation8]  }
  0x28   :  { %v63_v2 = vld [vmem:[#allocation2] sm:$0xff]  ;;  %v64_v3 = vld [vmem:[#allocation2 + $0x8] sm:$0xff]  ;;  %v65_v4 = vmax.f32 %v61_v0, 0.0001  ;;  %v66_v5 = vmax.f32 %v62_v1, 0.0001 }
  0x29   :  { %v71_v6 = vmax.f32 %v63_v2, 0.0001  ;;  %v72_v7 = vmax.f32 %v64_v3, 0.0001  ;;  %s95_s10 = sshll.u32 %s234_s1, 4  ;;  %s105_s12 = sshll.u32 %s235_s11, 4  ;;  %s96_s10 = int_to_ptr.vmem [resolvable:$true] %s95_s10  ;;  %s106_s12 = int_to_ptr.vmem [resolvable:$true] %s105_s12 }
  0x2a   :  { %126 = vlog2.f32 %v65_v4  ;;  %s178_s13 = scalar_lea.vmem %s96_s10, 128  ;;  %p183_p3 = scmp.lt.s32.totalorder %s96_s10, %s96_s10 }
  0x2b   :  { %128 = vlog2.f32 %v66_v5  ;;  %p179_p2 = scmp.ne.s32.totalorder %s96_s10, %s178_s13  ;;  %p184_p4 = scmp.lt.s32.totalorder %s178_s13, %s178_s13 }
  0x2c   :  { %130 = vlog2.f32 %v71_v6 }
  0x2d   :  { %132 = vlog2.f32 %v72_v7  ;;  %p185_p5 = por %p184_p4, %p183_p3 }
  0x2f   :  { %p186_p6 = pnand %p185_p5, %p179_p2 }
  0x34   :  { %v127_v8 = vpop.eup %126 }
  0x35   :  { %v129_v9 = vpop.eup %128  ;;  %v68_v10 = vmul.f32 0.6931472, %v127_v8 }
  0x36   :  { %v131_v11 = vpop.eup %130  ;;  %v70_v12 = vmul.f32 0.6931472, %v129_v9 }
  0x37   :  { %v133_v13 = vpop.eup %132  ;;  %v74_v14 = vmul.f32 0.6931472, %v131_v11 }
  0x38   :  { %v76_v15 = vmul.f32 0.6931472, %v133_v13 }
  0x39   :  { %v77_v16 = vsub.f32 %v68_v10, %v74_v14 }
  0x3a   :  { %v78_v17 = vsub.f32 %v70_v12, %v76_v15 }
  0x3b   :  { %v84_v18 = vmul.f32 %v77_v16, %v77_v16 }
  0x3c   :  { %v80_v19 = vadd.f32 %v78_v17, %v77_v16  ;;  %v85_v20 = vmul.f32 %v78_v17, %v78_v17 }
  0x3e   :  { %v86_v21 = vadd.f32 %v85_v20, %v84_v18  ;;  %82 = vst [vmem:[#allocation7] sm:$0xff] %v80_v19 }
  0x3f   :  { %189 = shalt.err (!%p186_p6)
}
  0x40   :  { %s190_s16 = scalar_lea.hbm %s306_s2, 128 }
  0x41   :  { %p191_p7 = scmp.ne.s32.totalorder %s306_s2, %s190_s16  ;;  %p194_p8 = scmp.lt.u32.totalorder %s190_s16, %s306_s2 }
  0x43   :  { %p196_p9 = pnand %p194_p8, %p191_p7 }
  0x45   :  { %199 = shalt.err (!%p196_p9)
}
  0x46   :  { %98 = dma.vmem_to_hbm [thread:$0]  %s96_s10, 128, %s306_s2, [#allocation4]   ;;  %88 = vst [vmem:[#allocation8] sm:$0xff] %v86_v21 }
  0x47   :  { %s200_s23 = scalar_lea.vmem %s106_s12, 128  ;;  %p205_p11 = scmp.lt.s32.totalorder %s106_s12, %s106_s12 }
  0x48   :  { %p201_p10 = scmp.ne.s32.totalorder %s106_s12, %s200_s23  ;;  %p206_p12 = scmp.lt.s32.totalorder %s200_s23, %s200_s23 }
  0x4a   :  { %p207_p13 = por %p206_p12, %p205_p11 }
  0x4c   :  { %p208_p0 = pnand %p207_p13, %p201_p10 }
  0x4e   :  { %211 = shalt.err (!%p208_p0)
}
  0x4f   :  { %s212_s26 = scalar_lea.hbm %s307_s3, 128 }
  0x50   :  { %p213_p1 = scmp.ne.s32.totalorder %s307_s3, %s212_s26  ;;  %p216_p2 = scmp.lt.u32.totalorder %s212_s26, %s307_s3 }
  0x52   :  { %p218_p3 = pnand %p216_p2, %p213_p1 }
  0x54   :  { %221 = shalt.err (!%p218_p3)
}
  0x55   :  { %108 = dma.vmem_to_hbm [thread:$0]  %s106_s12, 128, %s307_s3, [#allocation9]  }
  0x56   :  { %226 = dma.done.wait [#allocation4], 128  }
  0x57   :  { %227 = vsyncadd [#allocation4], 4294967168 }
  0x58   :  { %228 = dma.done.wait [#allocation9], 128  }
  0x59   :  { %229 = vsyncadd [#allocation9], 4294967168 }
  0x5a   :  { %115 = vsyncpa [#allocation3], 1 }
  0x5b   :  { %116 = vsyncpa [#allocation6], 1 }
  0x5c   :  { %117 = vsyncpa [#allocation4], 1 }
  0x5d   :  { %118 = vsyncpa [#allocation9], 1 }

</bundles_post_ra>
